<compile_context>
chip_gen: v5e
topology: v5e:2x2
jax: 0.10.0
libtpu: 0.0.40
codegen_flags: <defaults>
</compile_context>

<pallas_src>
import functools
import math

import jax
import jax.numpy as jnp
from jax.experimental import pallas as pl
from jax.experimental.pallas import tpu as pltpu


def _round_up(x, m):
    return ((x + m - 1) // m) * m


def _invcdf_kernel(thr_ref, cdf_ref, out_ref, acc_ref, *, ntokens):
    """Inverse-CDF search, tiled over the token axis.

    thr_ref: VMEM (TS, 1)  f32  thresholds t_i = u_i * total_mass
    cdf_ref: VMEM (1, TN)  f32  one tile of the inclusive CDF
    out_ref: VMEM (TS, 1)  i32  sampled token ids (written at the last tile)
    acc_ref: VMEM (TS, 1)  i32  running count #{j seen so far : cdf[j] <= t_i}
    """
    k = pl.program_id(1)

    @pl.when(k == 0)
    def _init():
        acc_ref[...] = jnp.zeros_like(acc_ref)

    # (1, TN) cdf vs (TS, 1) thresholds -> (TS, TN) compare on the VPU,
    # reduced over lanes (XLU) straight into the resident accumulator.
    hits = cdf_ref[...] <= thr_ref[...]
    acc_ref[...] += jnp.sum(hits.astype(jnp.int32), axis=1, keepdims=True)

    @pl.when(k == pl.num_programs(1) - 1)
    def _finalize():
        # Clamp: if a threshold rounds up to exactly the total mass, the count
        # would include the constant zero-weight padded tail; keep ids in
        # [0, ntokens).
        out_ref[...] = jnp.minimum(acc_ref[...], ntokens - 1)


class SplitNegativeSamplerPallas:
    """JAX/Pallas port of treelang's SplitNegativeSampler."""

    def __init__(self, nsamples, frequencies, splits, exp=0.75):
        freqs = jnp.asarray(frequencies, jnp.float32)
        self.nsamples = int(nsamples)
        self.frequencies = jnp.power(freqs / jnp.sum(freqs), exp)
        self.ntokens = int(freqs.shape[0])
        self.splits = list(splits)
        self.nsplits = len(self.splits) - 1

        # ---- static precompute: one CDF row + total mass per split ----------
        # Token axis padded to a lane multiple; padded slots carry zero weight,
        # so the CDF is constant (== total) over the tail.
        self.n_pad = _round_up(self.ntokens, 128)
        freq_pad = jnp.zeros((self.n_pad,), jnp.float32).at[: self.ntokens].set(
            self.frequencies
        )
        ids = jnp.arange(self.n_pad, dtype=jnp.int32)
        tomb_lo = self.ntokens - self.nsplits + 1

        self.cdf_rows = []  # each (1, n_pad) f32
        self.totals = []    # each () f32
        for s in range(self.nsplits):
            lo = self.splits[s]
            hi = min(self.splits[s + 1], tomb_lo)
            mask = (ids >= lo) & (ids < hi)
            if s == 0:  # tombstones belong to split 0
                mask = mask | ((ids >= tomb_lo) & (ids < self.ntokens))
            masked = jnp.where(mask, freq_pad, 0.0)
            cdf = jnp.cumsum(masked)                  # inclusive CDF, (n_pad,)
            self.cdf_rows.append(cdf[None, :])
            # Total mass taken from the CDF itself (identical summation order),
            # so thresholds u * total stay <= cdf[last] up to one final clamp.
            self.totals.append(cdf[self.ntokens - 1])

        # ---- kernel tiling ---------------------------------------------------
        self.s_pad = _round_up(self.nsamples, 8)
        self.ts = math.gcd(self.s_pad, 128)   # sample-block rows (sublane axis)
        self.tn = math.gcd(self.n_pad, 512)   # token tile width (lane axis)
        grid = (self.s_pad // self.ts, self.n_pad // self.tn)

        self._call = pl.pallas_call(
            functools.partial(_invcdf_kernel, ntokens=self.ntokens),
            out_shape=jax.ShapeDtypeStruct((self.s_pad, 1), jnp.int32),
            grid_spec=pltpu.PrefetchScalarGridSpec(
                num_scalar_prefetch=0,
                grid=grid,
                in_specs=[
                    pl.BlockSpec((self.ts, 1), lambda i, k: (i, 0)),   # thresholds
                    pl.BlockSpec((1, self.tn), lambda i, k: (0, k)),   # cdf tile
                ],
                out_specs=pl.BlockSpec((self.ts, 1), lambda i, k: (i, 0)),
                scratch_shapes=[pltpu.VMEM((self.ts, 1), jnp.int32)],
            ),
            compiler_params=pltpu.CompilerParams(
                # Sample blocks are independent (-> 2 TCs on v7x); the token
                # axis is a running reduction into the resident accumulator.
                dimension_semantics=("parallel", "arbitrary"),
                vmem_limit_bytes=32 * 1024 * 1024,
            ),
        )

    def forward(self, split, key):
        cdf = self.cdf_rows[split]   # (1, n_pad) f32, precomputed in __init__
        total = self.totals[split]   # () f32

        # TODO(synk): torch.multinomial's exact RNG stream cannot be matched;
        # jax.random uniforms + inverse-CDF give the same distribution.
        u = jax.random.uniform(key, (self.s_pad, 1), dtype=jnp.float32)
        thresholds = u * total       # in [0, total)

        negs = self._call(thresholds, cdf)  # (s_pad, 1) int32
        # PyTorch returns int64; int32 is plenty for token ids.
        return negs[: self.nsamples, 0]

    __call__ = forward


if __name__ == "__main__":
    key = jax.random.PRNGKey(0)
    k_freq, k0, k1 = jax.random.split(key, 3)

    ntokens = 200                 # pads to n_pad = 256 on the lane axis
    nsamples = 16
    splits = [0, 80, 150, 198]    # 3 splits -> tombstones = {198, 199}

    # Deterministic synthetic frequency table (strictly positive).
    frequencies = jax.random.uniform(
        k_freq, (ntokens,), dtype=jnp.float32, minval=0.1, maxval=10.0
    )

    sampler = SplitNegativeSamplerPallas(nsamples, frequencies, splits, exp=0.75)

    # --- split 0: ids in [0, min(80, 198)) plus tombstones [198, 200) --------
    negs0 = jax.block_until_ready(sampler(0, k0))
    lo0, hi0 = splits[0], min(splits[1], ntokens - sampler.nsplits + 1)
    tomb_lo = ntokens - sampler.nsplits + 1
    ok0 = ((negs0 >= lo0) & (negs0 < hi0)) | ((negs0 >= tomb_lo) & (negs0 < ntokens))
    assert negs0.shape == (nsamples,)
    assert negs0.dtype == jnp.int32
    assert bool(jnp.all(ok0))

    # --- split 1: ids in [80, min(150, 198)), no tombstones -------------------
    negs1 = jax.block_until_ready(sampler(1, k1))
    lo1, hi1 = splits[1], min(splits[2], ntokens - sampler.nsplits + 1)
    assert bool(jnp.all((negs1 >= lo1) & (negs1 < hi1)))

    print("KERNEL_OK")
</pallas_src>

<mosaic_0001>
module attributes {stable_mosaic.version = 11 : i64} {
  func.func @_invcdf_kernel(%arg0: i32, %arg1: i32, %arg2: memref<16x1xf32, #tpu.memory_space<vmem>>, %arg3: memref<1x256xf32, #tpu.memory_space<vmem>>, %arg4: memref<16x1xi32, #tpu.memory_space<vmem>>, %arg5: memref<16x1xi32, #tpu.memory_space<vmem>>) attributes {dimension_semantics = [#tpu.dimension_semantics<parallel>, #tpu.dimension_semantics<arbitrary>], iteration_bounds = array<i64: 1, 1>, scalar_prefetch = 0 : i64, scratch_operands = 1 : i64, tpu.core_type = #tpu.core_type<tc>, window_params = [{transform_indices = @transform_0, window_bounds = array<i64: 16, 1>}, {transform_indices = @transform_1, window_bounds = array<i64: 1, 256>}, {transform_indices = @transform_2, window_bounds = array<i64: 16, 1>}]} {
    %c0_i32 = arith.constant 0 : i32
    %0 = arith.cmpi eq, %arg1, %c0_i32 : i32
    %1 = arith.extui %0 : i1 to i32
    %c0_i32_0 = arith.constant 0 : i32
    %2 = arith.cmpi ne, %1, %c0_i32_0 : i32
    scf.if %2 {
      %c0_i32_10 = arith.constant 0 : i32
      %17 = vector.broadcast %c0_i32_10 : i32 to vector<16x1xi32>
      %c0_11 = arith.constant 0 : index
      %c0_12 = arith.constant 0 : index
      %18 = vector.load %arg5[%c0_11, %c0_12] : memref<16x1xi32, #tpu.memory_space<vmem>>, vector<16x1xi32>
      tpu.vector_store %arg5[%c0_11, %c0_12], %17 {strides = array<i32>} : memref<16x1xi32, #tpu.memory_space<vmem>>, vector<16x1xi32>,
    } else {
    }
    %c0 = arith.constant 0 : index
    %c0_1 = arith.constant 0 : index
    %3 = vector.load %arg3[%c0, %c0_1] : memref<1x256xf32, #tpu.memory_space<vmem>>, vector<1x256xf32>
    %c0_2 = arith.constant 0 : index
    %c0_3 = arith.constant 0 : index
    %4 = vector.load %arg2[%c0_2, %c0_3] : memref<16x1xf32, #tpu.memory_space<vmem>>, vector<16x1xf32>
    %5 = vector.broadcast %3 : vector<1x256xf32> to vector<16x256xf32>
    %6 = vector.broadcast %4 : vector<16x1xf32> to vector<16x256xf32>
    %7 = arith.cmpf ole, %5, %6 : vector<16x256xf32>
    %c0_4 = arith.constant 0 : index
    %c0_5 = arith.constant 0 : index
    %8 = vector.load %arg5[%c0_4, %c0_5] : memref<16x1xi32, #tpu.memory_space<vmem>>, vector<16x1xi32>
    %9 = arith.extui %7 : vector<16x256xi1> to vector<16x256xi32>
    %cst = arith.constant dense<0> : vector<16xi32>
    %10 = vector.multi_reduction <add>, %9, %cst [1] : vector<16x256xi32> to vector<16xi32>
    %11 = vector.shape_cast %10 : vector<16xi32> to vector<16x1xi32>
    %12 = arith.addi %8, %11 : vector<16x1xi32>
    %c0_6 = arith.constant 0 : index
    %c0_7 = arith.constant 0 : index
    %13 = vector.load %arg5[%c0_6, %c0_7] : memref<16x1xi32, #tpu.memory_space<vmem>>, vector<16x1xi32>
    tpu.vector_store %arg5[%c0_6, %c0_7], %12 {strides = array<i32>} : memref<16x1xi32, #tpu.memory_space<vmem>>, vector<16x1xi32>,
    %c0_i32_8 = arith.constant 0 : i32
    %14 = arith.cmpi eq, %arg1, %c0_i32_8 : i32
    %15 = arith.extui %14 : i1 to i32
    %c0_i32_9 = arith.constant 0 : i32
    %16 = arith.cmpi ne, %15, %c0_i32_9 : i32
    scf.if %16 {
      %c0_10 = arith.constant 0 : index
      %c0_11 = arith.constant 0 : index
      %17 = vector.load %arg5[%c0_10, %c0_11] : memref<16x1xi32, #tpu.memory_space<vmem>>, vector<16x1xi32>
      %c199_i32 = arith.constant 199 : i32
      %18 = vector.broadcast %c199_i32 : i32 to vector<16x1xi32>
      %19 = arith.minsi %17, %18 : vector<16x1xi32>
      %c0_12 = arith.constant 0 : index
      %c0_13 = arith.constant 0 : index
      %20 = vector.load %arg4[%c0_12, %c0_13] : memref<16x1xi32, #tpu.memory_space<vmem>>, vector<16x1xi32>
      tpu.vector_store %arg4[%c0_12, %c0_13], %19 {strides = array<i32>} : memref<16x1xi32, #tpu.memory_space<vmem>>, vector<16x1xi32>,
    } else {
    }
    return
  }
  func.func @transform_0(%arg0: i32, %arg1: i32) -> (i32, i32) {
    %c0_i32 = arith.constant 0 : i32
    %c0_i32_0 = arith.constant 0 : i32
    return %arg0, %c0_i32 : i32, i32
  }
  func.func @transform_1(%arg0: i32, %arg1: i32) -> (i32, i32) {
    %c0_i32 = arith.constant 0 : i32
    %c0_i32_0 = arith.constant 0 : i32
    return %c0_i32, %arg1 : i32, i32
  }
  func.func @transform_2(%arg0: i32, %arg1: i32) -> (i32, i32) {
    %c0_i32 = arith.constant 0 : i32
    %c0_i32_0 = arith.constant 0 : i32
    return %arg0, %c0_i32 : i32, i32
  }
}

</mosaic_0001>

<bundles_post_ra>
// kernel: tpu_custom_call.1
= control target key start
LH: loop header
LB: loop body
LE: loop exit
PB: predicated region body
PF: predicated region fallthrough
CT: control target
= control target key end

     0   :  { %v94_v0 = vmov 0   ;;  %vm15_vm4 = vcmask 7168   ;;  %s131_s0 = inlined_call_operand.vmem [shape: f32[16,1], index: 0, kind: input, shape index: {}]   ;;  %s132_s1 = inlined_call_operand.vmem [shape: f32[1,256], index: 1, kind: input, shape index: {}]   ;;  %s133_s2 = inlined_call_operand.vmem [shape: s32[16,1], index: 2, kind: output, shape index: {}]  }
   0x1   :  { %93 = vset.pattern.permute.xlu0 %v94_v0  ;;  %v19_v1 = vld [vmem:[%s131_s0] sm:$0xff]  ;;  %v20_v2 = vld [vmem:[%s131_s0 + $0x8] sm:$0xff]  ;;  %16 = vst.msk [vmem:[#allocation2] sm:$0xff] %vm15_vm4, %v94_v0 }
   0x2   :  { %28 = vperm.xlu0 %93, %v19_v1   ;;  %v18_v3 = vld [vmem:[%s132_s1] sm:$0x3]  ;;  %17 = vst.msk [vmem:[#allocation2 + $0x8] sm:$0xff] %vm15_vm4, %v94_v0 }
   0x3   :  { %v22_v4 = vperm.slane %v18_v3, 0  ;;  %v23_v5 = vperm.slane %v18_v3, 1 }
   0x8   :  { %v40_v27 = vld [vmem:[#allocation2] sm:$0xff] }
   0x9   :  { %v41_v35 = vld [vmem:[#allocation2 + $0x8] sm:$0xff] }
   0xa   :  { %33 = vperm.xlu0 %93, %v20_v2  }
  0x74   :  { %v29_v6 = vpop.permute.xlu0 %28 }
  0x75   :  { %vm36_vm0 = vcmp.le.f32.partialorder %v22_v4, %v29_v6  ;;  %vm37_vm1 = vcmp.le.f32.partialorder %v23_v5, %v29_v6 }
  0x76   :  { %v42_v7 = vsel %vm36_vm0, 1, %v94_v0  ;;  %v43_v8 = vsel %vm37_vm1, 1, %v94_v0 }
  0x77   :  { %v46_v9 = vadd.s32 %v43_v8, %v42_v7 }
  0x79   :  { %v48_v10 = vshrl.u32 %v46_v9, 16  ;;  %v47_v11 = vand.u32 65535, %v46_v9 }
  0x7b   :  { %v50_v12 = vcvt.s32.f32 %v48_v10  ;;  %v49_v13 = vcvt.s32.f32 %v47_v11 }
  0x7c   :  { %v34_v14 = vpop.permute.xlu0 %33 }
  0x7d   :  { %vm38_vm2 = vcmp.le.f32.partialorder %v22_v4, %v34_v14  ;;  %vm39_vm3 = vcmp.le.f32.partialorder %v23_v5, %v34_v14  ;;  %53 = vadd.xlane.f32.xlu1 %v50_v12  ;;  %51 = vadd.xlane.f32.xlu2 %v49_v13 }
  0x7e   :  { %v44_v15 = vsel %vm38_vm2, 1, %v94_v0  ;;  %v45_v16 = vsel %vm39_vm3, 1, %v94_v0 }
  0x7f   :  { %v59_v17 = vadd.s32 %v45_v16, %v44_v15 }
  0x81   :  { %v61_v18 = vshrl.u32 %v59_v17, 16  ;;  %v60_v19 = vand.u32 65535, %v59_v17 }
  0x83   :  { %v63_v20 = vcvt.s32.f32 %v61_v18  ;;  %v62_v21 = vcvt.s32.f32 %v60_v19 }
  0x85   :  { %66 = vadd.xlane.f32.xlu1 %v63_v20  ;;  %64 = vadd.xlane.f32.xlu2 %v62_v21 }
  0xf0   :  { %v54_v22 = vpop.xlane.xlu1 %53  ;;  %v52_v23 = vpop.xlane.xlu2 %51 }
  0xf1   :  { %v56_v24 = vcvt.f32.s32 %v54_v22  ;;  %v55_v26 = vcvt.f32.s32 %v52_v23 }
  0xf3   :  { %v57_v25 = vshll.u32 %v56_v24, 16 }
  0xf5   :  { %v58_v28 = vadd.s32 %v57_v25, %v55_v26 }
  0xf7   :  { %v72_v29 = vadd.s32 %v58_v28, %v40_v27 }
  0xf8   :  { %v67_v30 = vpop.xlane.xlu1 %66  ;;  %v65_v31 = vpop.xlane.xlu2 %64 }
  0xf9   :  { %75 = vst.msk [vmem:[#allocation2] sm:$0xff] %vm15_vm4, %v72_v29  ;;  %v69_v32 = vcvt.f32.s32 %v67_v30  ;;  %v68_v34 = vcvt.f32.s32 %v65_v31 }
  0xfb   :  { %v70_v33 = vshll.u32 %v69_v32, 16 }
  0xfd   :  { %v71_v36 = vadd.s32 %v70_v33, %v68_v34 }
  0xff   :  { %v73_v37 = vadd.s32 %v71_v36, %v41_v35 }
 0x100   :  { %v80_v38 = vld [vmem:[#allocation2] sm:$0xff] }
 0x101   :  { %vm82_vm5 = vcmp.lt.s32.totalorder %v80_v38, 199  ;;  %76 = vst.msk [vmem:[#allocation2 + $0x8] sm:$0xff] %vm15_vm4, %v73_v37 }
 0x102   :  { %v83_v39 = vsel %vm82_vm5, %v80_v38, 199 }
 0x103   :  { %86 = vst.msk [vmem:[%s133_s2] sm:$0xff] %vm15_vm4, %v83_v39 }
 0x108   :  { %v81_v40 = vld [vmem:[#allocation2 + $0x8] sm:$0xff] }
 0x109   :  { %vm84_vm6 = vcmp.lt.s32.totalorder %v81_v40, 199 }
 0x10a   :  { %v85_v41 = vsel %vm84_vm6, %v81_v40, 199 }
 0x10b   :  { %87 = vst.msk [vmem:[%s133_s2 + $0x8] sm:$0xff] %vm15_vm4, %v85_v41 }

</bundles_post_ra>
